<compile_context>
chip_gen: v5e
topology: v5e:2x2
jax: 0.10.0
libtpu: 0.0.40
codegen_flags: <defaults>
</compile_context>

<pallas_src>
import functools
import math

import jax
import jax.numpy as jnp
from jax.experimental import pallas as pl
from jax.experimental.pallas import tpu as pltpu


# ---------------------------------------------------------------------------
# Pallas kernel: one EncoderLayer forward for one batch element (grid axis).
# ---------------------------------------------------------------------------
def encoder_layer_kernel(feat_ref, pos_ref, wq_ref, wk_ref, wv_ref, wo_ref,
                         vecs_ref, w1_ref, b1_ref, w2_ref, out_ref,
                         *, num_heads, compute_dtype):
    f32 = jnp.float32
    cd = compute_dtype

    x = feat_ref[...].astype(f32)                    # (S, D)
    p = pos_ref[...].astype(f32)
    S, D = x.shape
    H = num_heads
    dh = D // H

    xq = x + p                                       # q/k input; v uses x

    # ---- small packed (1, D) params: bq(scaled), bk, bv, bo, ga, ba, b2, gm, bm
    vecs = vecs_ref[...].astype(f32)                 # (9, D)
    bq = vecs[0:1]
    bk = vecs[1:2]
    bv = vecs[2:3]
    bo = vecs[3:4]
    ga = vecs[4:5]
    ba = vecs[5:6]
    b2 = vecs[6:7]
    gm = vecs[7:8]
    bm = vecs[8:9]

    # ---- QKV projections: lane-dense (S, D) @ (D, D) matmuls (f32 accum).
    # 1/sqrt(dh) is already folded into wq / bq on the host.
    q = jnp.dot(xq.astype(cd), wq_ref[...].astype(cd),
                preferred_element_type=f32) + bq
    k = jnp.dot(xq.astype(cd), wk_ref[...].astype(cd),
                preferred_element_type=f32) + bk
    v = jnp.dot(x.astype(cd), wv_ref[...].astype(cd),
                preferred_element_type=f32) + bv

    # ---- head split (lane slices + stack; no activation replication) and
    #      head-batched score / context dot_generals.
    qh = jnp.stack([q[:, h * dh:(h + 1) * dh] for h in range(H)], axis=0)
    kh = jnp.stack([k[:, h * dh:(h + 1) * dh] for h in range(H)], axis=0)
    vh = jnp.stack([v[:, h * dh:(h + 1) * dh] for h in range(H)], axis=0)

    s = jnp.einsum("hqe,hke->hqk", qh.astype(cd), kh.astype(cd),
                   preferred_element_type=f32)       # (H, S, S), f32
    s = s - jnp.max(s, axis=-1, keepdims=True)
    e = jnp.exp(s)
    denom = jnp.sum(e, axis=-1, keepdims=True)
    a = e * pl.reciprocal(denom, approx=False)       # exact divide for accuracy
    ctx = jnp.einsum("hqk,hke->hqe", a.astype(cd), vh.astype(cd),
                     preferred_element_type=f32)     # (H, S, dh)

    # concat heads along lanes -> (S, D); output projection is one matmul so
    # the head reduction happens inside the MXU contraction.
    ctx2 = jnp.concatenate([ctx[h] for h in range(H)], axis=-1)     # (S, D)
    attn = jnp.dot(ctx2.astype(cd), wo_ref[...].astype(cd),
                   preferred_element_type=f32) + bo                 # (S, D)

    # ---- residual + LayerNorm (attn), f32 elementwise (v5e-safe).
    y = x + attn
    mu = jnp.mean(y, axis=-1, keepdims=True)
    var = jnp.mean((y - mu) ** 2, axis=-1, keepdims=True)
    y = (y - mu) * jax.lax.rsqrt(var + 1e-5) * ga + ba

    # ---- MLP: linear1 -> relu -> (dropout = identity) -> linear2.
    h1 = jnp.dot(y.astype(cd), w1_ref[...].astype(cd),
                 preferred_element_type=f32) + b1_ref[...].astype(f32)
    h1 = jnp.maximum(h1, 0.0)
    ff = jnp.dot(h1.astype(cd), w2_ref[...].astype(cd),
                 preferred_element_type=f32) + b2

    # ---- residual + LayerNorm (mlp).
    z = y + ff
    mu2 = jnp.mean(z, axis=-1, keepdims=True)
    var2 = jnp.mean((z - mu2) ** 2, axis=-1, keepdims=True)
    z = (z - mu2) * jax.lax.rsqrt(var2 + 1e-5) * gm + bm

    out_ref[...] = z.astype(out_ref.dtype)


# ---------------------------------------------------------------------------
# Wrapper: host-side (one-time) repacking + a batch-gridded pallas_call.
# ---------------------------------------------------------------------------
def encoder_layer_forward(features, pos_enc, params, num_heads,
                          compute_dtype=jnp.bfloat16):
    B, S, D = features.shape
    dh = D // num_heads
    scale = 1.0 / math.sqrt(dh)
    M = params["w1"].shape[1]

    # Fold 1/sqrt(dh) into the q projection (one-time, host side).
    wq = params["wq"] * scale
    bq = params["bq"] * scale

    # Pack the ten tiny (1, D) vectors into one (9, D) slab.
    vecs = jnp.concatenate([bq, params["bk"], params["bv"], params["bo"],
                            params["ga"], params["ba"], params["b2"],
                            params["gm"], params["bm"]], axis=0)     # (9, D)

    feat2d = features.reshape(B * S, D)
    pos2d = pos_enc.reshape(B * S, D)

    kernel = functools.partial(encoder_layer_kernel,
                               num_heads=num_heads,
                               compute_dtype=compute_dtype)

    # Row tiles follow the batch grid axis; weights return block (0, ...) every
    # step so they stay resident in VMEM across the grid.
    row_spec = pl.BlockSpec((S, D), lambda b: (b, 0))

    def resident(shape):
        return pl.BlockSpec(shape, lambda b, _n=len(shape): (0,) * _n)

    out2d = pl.pallas_call(
        kernel,
        out_shape=jax.ShapeDtypeStruct((B * S, D), features.dtype),
        grid=(B,),
        in_specs=[
            row_spec,                 # features rows
            row_spec,                 # pos_enc rows
            resident((D, D)),         # wq (pre-scaled)
            resident((D, D)),         # wk
            resident((D, D)),         # wv
            resident((D, D)),         # wo
            resident((9, D)),         # packed small vectors
            resident((D, M)),         # w1
            resident((1, M)),         # b1
            resident((M, D)),         # w2
        ],
        out_specs=row_spec,
        compiler_params=pltpu.CompilerParams(
            # batch axis is independent -> shard across TensorCores (v7x: 2 TC).
            dimension_semantics=("parallel",),
        ),
    )(feat2d, pos2d, wq, params["wk"], params["wv"], params["wo"],
      vecs, params["w1"], params["b1"], params["w2"])

    return out2d.reshape(B, S, D)


def encoder_forward(features, pos_enc, layer_params, num_heads,
                    compute_dtype=jnp.bfloat16):
    # The PyTorch Encoder applies every layer to the ORIGINAL inputs and
    # returns only the last layer's output -> running just the last layer is
    # exactly equivalent.
    assert len(layer_params) >= 1
    return encoder_layer_forward(features, pos_enc, layer_params[-1],
                                 num_heads, compute_dtype)


# ---------------------------------------------------------------------------
# Pure-JAX reference for verification.
# ---------------------------------------------------------------------------
def layer_ref(x, p, prm, num_heads):
    B, S, D = x.shape
    dh = D // num_heads
    scale = 1.0 / math.sqrt(dh)
    xq = x + p
    q = xq @ prm["wq"] + prm["bq"]
    k = xq @ prm["wk"] + prm["bk"]
    v = x @ prm["wv"] + prm["bv"]
    q = q.reshape(B, S, num_heads, dh).transpose(0, 2, 1, 3)
    k = k.reshape(B, S, num_heads, dh).transpose(0, 2, 1, 3)
    v = v.reshape(B, S, num_heads, dh).transpose(0, 2, 1, 3)
    s = jnp.einsum("bhqd,bhkd->bhqk", q, k) * scale
    a = jax.nn.softmax(s, axis=-1)
    o = jnp.einsum("bhqk,bhkd->bhqd", a, v).transpose(0, 2, 1, 3).reshape(B, S, D)
    o = o @ prm["wo"] + prm["bo"]

    def ln(t, g, b):
        mu = jnp.mean(t, -1, keepdims=True)
        var = jnp.mean((t - mu) ** 2, -1, keepdims=True)
        return (t - mu) * jax.lax.rsqrt(var + 1e-5) * g + b

    y = ln(x + o, prm["ga"], prm["ba"])
    ff = jnp.maximum(y @ prm["w1"] + prm["b1"], 0.0) @ prm["w2"] + prm["b2"]
    return ln(y + ff, prm["gm"], prm["bm"])


# ---------------------------------------------------------------------------
def make_layer_params(key, D, M):
    ks = jax.random.split(key, 8)
    std = 0.05
    return {
        "wq": jax.random.normal(ks[0], (D, D), jnp.float32) * std,
        "wk": jax.random.normal(ks[1], (D, D), jnp.float32) * std,
        "wv": jax.random.normal(ks[2], (D, D), jnp.float32) * std,
        "bq": jax.random.normal(ks[3], (1, D), jnp.float32) * std,
        "bk": jnp.zeros((1, D), jnp.float32),
        "bv": jnp.zeros((1, D), jnp.float32),
        "wo": jax.random.normal(ks[4], (D, D), jnp.float32) * std,
        "bo": jnp.zeros((1, D), jnp.float32),
        "ga": jnp.ones((1, D), jnp.float32),
        "ba": jnp.zeros((1, D), jnp.float32),
        "w1": jax.random.normal(ks[5], (D, M), jnp.float32) * std,
        "b1": jax.random.normal(ks[6], (1, M), jnp.float32) * std,
        "w2": jax.random.normal(ks[7], (M, D), jnp.float32) * std,
        "b2": jnp.zeros((1, D), jnp.float32),
        "gm": jnp.ones((1, D), jnp.float32),
        "bm": jnp.zeros((1, D), jnp.float32),
    }


if __name__ == "__main__":
    B, S, D, H, M, L = 2, 8, 32, 4, 64, 2

    key = jax.random.PRNGKey(0)
    k_feat, k_pos, k_p = jax.random.split(key, 3)
    features = jax.random.normal(k_feat, (B, S, D), jnp.float32)
    pos_enc = jax.random.normal(k_pos, (B, S, D), jnp.float32)

    layer_params = [make_layer_params(k, D, M)
                    for k in jax.random.split(k_p, L)]

    ref = layer_ref(features, pos_enc, layer_params[-1], H)

    # f32 MXU-operand path: tight verification.
    out_f32 = encoder_forward(features, pos_enc, layer_params, H,
                              compute_dtype=jnp.float32)
    out_f32 = jax.block_until_ready(out_f32)
    assert out_f32.shape == (B, S, D)
    err_f32 = float(jnp.max(jnp.abs(out_f32 - ref)))
    assert jnp.allclose(out_f32, ref, atol=2e-3, rtol=2e-3), \
        f"f32 max err {err_f32}"

    # bf16 MXU-operand path (recommended default on v5e/v6e/v7x): loose check.
    out_bf16 = encoder_forward(features, pos_enc, layer_params, H,
                               compute_dtype=jnp.bfloat16)
    out_bf16 = jax.block_until_ready(out_bf16)
    err_bf16 = float(jnp.max(jnp.abs(out_bf16 - ref)))
    assert jnp.allclose(out_bf16, ref, atol=2e-1, rtol=2e-1), \
        f"bf16 max err {err_bf16}"

    print("KERNEL_OK")
</pallas_src>

<mosaic_0001>
module attributes {stable_mosaic.version = 11 : i64} {
  func.func @encoder_layer_kernel(%arg0: i32, %arg1: memref<8x32xf32, #tpu.memory_space<vmem>>, %arg2: memref<8x32xf32, #tpu.memory_space<vmem>>, %arg3: memref<32x32xf32, #tpu.memory_space<vmem>>, %arg4: memref<32x32xf32, #tpu.memory_space<vmem>>, %arg5: memref<32x32xf32, #tpu.memory_space<vmem>>, %arg6: memref<32x32xf32, #tpu.memory_space<vmem>>, %arg7: memref<9x32xf32, #tpu.memory_space<vmem>>, %arg8: memref<32x64xf32, #tpu.memory_space<vmem>>, %arg9: memref<1x64xf32, #tpu.memory_space<vmem>>, %arg10: memref<64x32xf32, #tpu.memory_space<vmem>>, %arg11: memref<8x32xf32, #tpu.memory_space<vmem>>) attributes {dimension_semantics = [#tpu.dimension_semantics<parallel>], iteration_bounds = array<i64: 2>, scalar_prefetch = 0 : i64, scratch_operands = 0 : i64, tpu.core_type = #tpu.core_type<tc>, window_params = [{transform_indices = @transform_0, window_bounds = array<i64: 8, 32>}, {transform_indices = @transform_1, window_bounds = array<i64: 8, 32>}, {pipeline_mode = #tpu.pipeline_mode<synchronous>, transform_indices = @transform_2, window_bounds = array<i64: 32, 32>}, {pipeline_mode = #tpu.pipeline_mode<synchronous>, transform_indices = @transform_3, window_bounds = array<i64: 32, 32>}, {pipeline_mode = #tpu.pipeline_mode<synchronous>, transform_indices = @transform_4, window_bounds = array<i64: 32, 32>}, {pipeline_mode = #tpu.pipeline_mode<synchronous>, transform_indices = @transform_5, window_bounds = array<i64: 32, 32>}, {pipeline_mode = #tpu.pipeline_mode<synchronous>, transform_indices = @transform_6, window_bounds = array<i64: 9, 32>}, {pipeline_mode = #tpu.pipeline_mode<synchronous>, transform_indices = @transform_7, window_bounds = array<i64: 32, 64>}, {pipeline_mode = #tpu.pipeline_mode<synchronous>, transform_indices = @transform_8, window_bounds = array<i64: 1, 64>}, {pipeline_mode = #tpu.pipeline_mode<synchronous>, transform_indices = @transform_9, window_bounds = array<i64: 64, 32>}, {transform_indices = @transform_10, window_bounds = array<i64: 8, 32>}]} {
    %c0 = arith.constant 0 : index
    %c0_0 = arith.constant 0 : index
    %0 = vector.load %arg1[%c0, %c0_0] : memref<8x32xf32, #tpu.memory_space<vmem>>, vector<8x32xf32>
    %c0_1 = arith.constant 0 : index
    %c0_2 = arith.constant 0 : index
    %1 = vector.load %arg2[%c0_1, %c0_2] : memref<8x32xf32, #tpu.memory_space<vmem>>, vector<8x32xf32>
    %2 = arith.addf %0, %1 : vector<8x32xf32>
    %c0_3 = arith.constant 0 : index
    %c0_4 = arith.constant 0 : index
    %3 = vector.load %arg7[%c0_3, %c0_4] : memref<9x32xf32, #tpu.memory_space<vmem>>, vector<9x32xf32>
    %4 = vector.extract_strided_slice %3 {offsets = [0, 0], sizes = [1, 32], strides = [1, 1]} : vector<9x32xf32> to vector<1x32xf32>
    %5 = vector.extract_strided_slice %3 {offsets = [1, 0], sizes = [1, 32], strides = [1, 1]} : vector<9x32xf32> to vector<1x32xf32>
    %6 = vector.extract_strided_slice %3 {offsets = [2, 0], sizes = [1, 32], strides = [1, 1]} : vector<9x32xf32> to vector<1x32xf32>
    %7 = vector.extract_strided_slice %3 {offsets = [3, 0], sizes = [1, 32], strides = [1, 1]} : vector<9x32xf32> to vector<1x32xf32>
    %8 = vector.extract_strided_slice %3 {offsets = [4, 0], sizes = [1, 32], strides = [1, 1]} : vector<9x32xf32> to vector<1x32xf32>
    %9 = vector.extract_strided_slice %3 {offsets = [5, 0], sizes = [1, 32], strides = [1, 1]} : vector<9x32xf32> to vector<1x32xf32>
    %10 = vector.extract_strided_slice %3 {offsets = [6, 0], sizes = [1, 32], strides = [1, 1]} : vector<9x32xf32> to vector<1x32xf32>
    %11 = vector.extract_strided_slice %3 {offsets = [7, 0], sizes = [1, 32], strides = [1, 1]} : vector<9x32xf32> to vector<1x32xf32>
    %12 = vector.extract_strided_slice %3 {offsets = [8, 0], sizes = [1, 32], strides = [1, 1]} : vector<9x32xf32> to vector<1x32xf32>
    %c0_5 = arith.constant 0 : index
    %c0_6 = arith.constant 0 : index
    %13 = vector.load %arg3[%c0_5, %c0_6] : memref<32x32xf32, #tpu.memory_space<vmem>>, vector<32x32xf32>
    %cst = arith.constant dense<0.000000e+00> : vector<8x32xf32>
    %14 = tpu.matmul %2, %13, %cst {dimension_numbers = #tpu.dot_dimension_numbers<[1], [0], [0], [1], [0, 0, 1, 1], [], []>} : vector<8x32xf32>, vector<32x32xf32>, vector<8x32xf32> -> vector<8x32xf32>
    %15 = vector.broadcast %4 : vector<1x32xf32> to vector<8x32xf32>
    %16 = arith.addf %14, %15 : vector<8x32xf32>
    %c0_7 = arith.constant 0 : index
    %c0_8 = arith.constant 0 : index
    %17 = vector.load %arg4[%c0_7, %c0_8] : memref<32x32xf32, #tpu.memory_space<vmem>>, vector<32x32xf32>
    %cst_9 = arith.constant dense<0.000000e+00> : vector<8x32xf32>
    %18 = tpu.matmul %2, %17, %cst_9 {dimension_numbers = #tpu.dot_dimension_numbers<[1], [0], [0], [1], [0, 0, 1, 1], [], []>} : vector<8x32xf32>, vector<32x32xf32>, vector<8x32xf32> -> vector<8x32xf32>
    %19 = vector.broadcast %5 : vector<1x32xf32> to vector<8x32xf32>
    %20 = arith.addf %18, %19 : vector<8x32xf32>
    %c0_10 = arith.constant 0 : index
    %c0_11 = arith.constant 0 : index
    %21 = vector.load %arg5[%c0_10, %c0_11] : memref<32x32xf32, #tpu.memory_space<vmem>>, vector<32x32xf32>
    %cst_12 = arith.constant dense<0.000000e+00> : vector<8x32xf32>
    %22 = tpu.matmul %0, %21, %cst_12 {dimension_numbers = #tpu.dot_dimension_numbers<[1], [0], [0], [1], [0, 0, 1, 1], [], []>} : vector<8x32xf32>, vector<32x32xf32>, vector<8x32xf32> -> vector<8x32xf32>
    %23 = vector.broadcast %6 : vector<1x32xf32> to vector<8x32xf32>
    %24 = arith.addf %22, %23 : vector<8x32xf32>
    %25 = vector.extract_strided_slice %16 {offsets = [0, 0], sizes = [8, 8], strides = [1, 1]} : vector<8x32xf32> to vector<8x8xf32>
    %26 = vector.extract_strided_slice %16 {offsets = [0, 8], sizes = [8, 8], strides = [1, 1]} : vector<8x32xf32> to vector<8x8xf32>
    %27 = vector.extract_strided_slice %16 {offsets = [0, 16], sizes = [8, 8], strides = [1, 1]} : vector<8x32xf32> to vector<8x8xf32>
    %28 = vector.extract_strided_slice %16 {offsets = [0, 24], sizes = [8, 8], strides = [1, 1]} : vector<8x32xf32> to vector<8x8xf32>
    %29 = vector.shape_cast %25 : vector<8x8xf32> to vector<1x8x8xf32>
    %30 = vector.shape_cast %26 : vector<8x8xf32> to vector<1x8x8xf32>
    %31 = vector.shape_cast %27 : vector<8x8xf32> to vector<1x8x8xf32>
    %32 = vector.shape_cast %28 : vector<8x8xf32> to vector<1x8x8xf32>
    %33 = tpu.concatenate %29, %30, %31, %32 in 0 : vector<1x8x8xf32>, vector<1x8x8xf32>, vector<1x8x8xf32>, vector<1x8x8xf32> -> vector<4x8x8xf32>
    %34 = vector.extract_strided_slice %20 {offsets = [0, 0], sizes = [8, 8], strides = [1, 1]} : vector<8x32xf32> to vector<8x8xf32>
    %35 = vector.extract_strided_slice %20 {offsets = [0, 8], sizes = [8, 8], strides = [1, 1]} : vector<8x32xf32> to vector<8x8xf32>
    %36 = vector.extract_strided_slice %20 {offsets = [0, 16], sizes = [8, 8], strides = [1, 1]} : vector<8x32xf32> to vector<8x8xf32>
    %37 = vector.extract_strided_slice %20 {offsets = [0, 24], sizes = [8, 8], strides = [1, 1]} : vector<8x32xf32> to vector<8x8xf32>
    %38 = vector.shape_cast %34 : vector<8x8xf32> to vector<1x8x8xf32>
    %39 = vector.shape_cast %35 : vector<8x8xf32> to vector<1x8x8xf32>
    %40 = vector.shape_cast %36 : vector<8x8xf32> to vector<1x8x8xf32>
    %41 = vector.shape_cast %37 : vector<8x8xf32> to vector<1x8x8xf32>
    %42 = tpu.concatenate %38, %39, %40, %41 in 0 : vector<1x8x8xf32>, vector<1x8x8xf32>, vector<1x8x8xf32>, vector<1x8x8xf32> -> vector<4x8x8xf32>
    %43 = vector.extract_strided_slice %24 {offsets = [0, 0], sizes = [8, 8], strides = [1, 1]} : vector<8x32xf32> to vector<8x8xf32>
    %44 = vector.extract_strided_slice %24 {offsets = [0, 8], sizes = [8, 8], strides = [1, 1]} : vector<8x32xf32> to vector<8x8xf32>
    %45 = vector.extract_strided_slice %24 {offsets = [0, 16], sizes = [8, 8], strides = [1, 1]} : vector<8x32xf32> to vector<8x8xf32>
    %46 = vector.extract_strided_slice %24 {offsets = [0, 24], sizes = [8, 8], strides = [1, 1]} : vector<8x32xf32> to vector<8x8xf32>
    %47 = vector.shape_cast %43 : vector<8x8xf32> to vector<1x8x8xf32>
    %48 = vector.shape_cast %44 : vector<8x8xf32> to vector<1x8x8xf32>
    %49 = vector.shape_cast %45 : vector<8x8xf32> to vector<1x8x8xf32>
    %50 = vector.shape_cast %46 : vector<8x8xf32> to vector<1x8x8xf32>
    %51 = tpu.concatenate %47, %48, %49, %50 in 0 : vector<1x8x8xf32>, vector<1x8x8xf32>, vector<1x8x8xf32>, vector<1x8x8xf32> -> vector<4x8x8xf32>
    "tpu.trace_start"() <{level = 10 : i32, message = "hqe,hke->hqk"}> : () -> ()
    %cst_13 = arith.constant dense<0.000000e+00> : vector<4x8x8xf32>
    %52 = tpu.matmul %33, %42, %cst_13 {dimension_numbers = #tpu.dot_dimension_numbers<[2], [2], [1], [1], [0, 0, 0, 1, 1, 1], [0], [0]>} : vector<4x8x8xf32>, vector<4x8x8xf32>, vector<4x8x8xf32> -> vector<4x8x8xf32>
    "tpu.trace_stop"() : () -> ()
    %cst_14 = arith.constant dense<0xFF800000> : vector<4x8xf32>
    %53 = vector.multi_reduction <maximumf>, %52, %cst_14 [2] : vector<4x8x8xf32> to vector<4x8xf32>
    %54 = vector.shape_cast %53 : vector<4x8xf32> to vector<4x8x1xf32>
    %55 = vector.broadcast %54 : vector<4x8x1xf32> to vector<4x8x8xf32>
    %56 = arith.subf %52, %55 : vector<4x8x8xf32>
    %57 = math.exp %56 : vector<4x8x8xf32>
    %cst_15 = arith.constant dense<0.000000e+00> : vector<4x8xf32>
    %58 = vector.multi_reduction <add>, %57, %cst_15 [2] : vector<4x8x8xf32> to vector<4x8xf32>
    %59 = vector.shape_cast %58 : vector<4x8xf32> to vector<4x8x1xf32>
    %60 = tpu.reciprocal %59 : vector<4x8x1xf32> -> vector<4x8x1xf32>
    %61 = vector.broadcast %60 : vector<4x8x1xf32> to vector<4x8x8xf32>
    %62 = arith.mulf %57, %61 : vector<4x8x8xf32>
    "tpu.trace_start"() <{level = 10 : i32, message = "hqk,hke->hqe"}> : () -> ()
    %cst_16 = arith.constant dense<0.000000e+00> : vector<4x8x8xf32>
    %63 = tpu.matmul %62, %51, %cst_16 {dimension_numbers = #tpu.dot_dimension_numbers<[2], [1], [1], [2], [0, 0, 0, 1, 1, 2], [0], [0]>} : vector<4x8x8xf32>, vector<4x8x8xf32>, vector<4x8x8xf32> -> vector<4x8x8xf32>
    "tpu.trace_stop"() : () -> ()
    %64 = vector.extract_strided_slice %63 {offsets = [0, 0, 0], sizes = [1, 8, 8], strides = [1, 1, 1]} : vector<4x8x8xf32> to vector<1x8x8xf32>
    %65 = vector.shape_cast %64 : vector<1x8x8xf32> to vector<8x8xf32>
    %66 = vector.extract_strided_slice %63 {offsets = [1, 0, 0], sizes = [1, 8, 8], strides = [1, 1, 1]} : vector<4x8x8xf32> to vector<1x8x8xf32>
    %67 = vector.shape_cast %66 : vector<1x8x8xf32> to vector<8x8xf32>
    %68 = vector.extract_strided_slice %63 {offsets = [2, 0, 0], sizes = [1, 8, 8], strides = [1, 1, 1]} : vector<4x8x8xf32> to vector<1x8x8xf32>
    %69 = vector.shape_cast %68 : vector<1x8x8xf32> to vector<8x8xf32>
    %70 = vector.extract_strided_slice %63 {offsets = [3, 0, 0], sizes = [1, 8, 8], strides = [1, 1, 1]} : vector<4x8x8xf32> to vector<1x8x8xf32>
    %71 = vector.shape_cast %70 : vector<1x8x8xf32> to vector<8x8xf32>
    %72 = tpu.concatenate %65, %67, %69, %71 in 1 : vector<8x8xf32>, vector<8x8xf32>, vector<8x8xf32>, vector<8x8xf32> -> vector<8x32xf32>
    %c0_17 = arith.constant 0 : index
    %c0_18 = arith.constant 0 : index
    %73 = vector.load %arg6[%c0_17, %c0_18] : memref<32x32xf32, #tpu.memory_space<vmem>>, vector<32x32xf32>
    %cst_19 = arith.constant dense<0.000000e+00> : vector<8x32xf32>
    %74 = tpu.matmul %72, %73, %cst_19 {dimension_numbers = #tpu.dot_dimension_numbers<[1], [0], [0], [1], [0, 0, 1, 1], [], []>} : vector<8x32xf32>, vector<32x32xf32>, vector<8x32xf32> -> vector<8x32xf32>
    %75 = vector.broadcast %7 : vector<1x32xf32> to vector<8x32xf32>
    %76 = arith.addf %74, %75 : vector<8x32xf32>
    %77 = arith.addf %0, %76 : vector<8x32xf32>
    %cst_20 = arith.constant dense<0.000000e+00> : vector<8xf32>
    %78 = vector.multi_reduction <add>, %77, %cst_20 [1] : vector<8x32xf32> to vector<8xf32>
    %79 = vector.shape_cast %78 : vector<8xf32> to vector<8x1xf32>
    %cst_21 = arith.constant 3.200000e+01 : f32
    %80 = vector.broadcast %cst_21 : f32 to vector<8x1xf32>
    %81 = arith.divf %79, %80 : vector<8x1xf32>
    %82 = vector.broadcast %81 : vector<8x1xf32> to vector<8x32xf32>
    %83 = arith.subf %77, %82 : vector<8x32xf32>
    %84 = arith.mulf %83, %83 : vector<8x32xf32>
    %cst_22 = arith.constant dense<0.000000e+00> : vector<8xf32>
    %85 = vector.multi_reduction <add>, %84, %cst_22 [1] : vector<8x32xf32> to vector<8xf32>
    %86 = vector.shape_cast %85 : vector<8xf32> to vector<8x1xf32>
    %cst_23 = arith.constant 3.200000e+01 : f32
    %87 = vector.broadcast %cst_23 : f32 to vector<8x1xf32>
    %88 = arith.divf %86, %87 : vector<8x1xf32>
    %89 = vector.broadcast %81 : vector<8x1xf32> to vector<8x32xf32>
    %90 = arith.subf %77, %89 : vector<8x32xf32>
    %cst_24 = arith.constant 9.99999974E-6 : f32
    %91 = vector.broadcast %cst_24 : f32 to vector<8x1xf32>
    %92 = arith.addf %88, %91 : vector<8x1xf32>
    %93 = math.rsqrt %92 : vector<8x1xf32>
    %94 = vector.broadcast %93 : vector<8x1xf32> to vector<8x32xf32>
    %95 = arith.mulf %90, %94 : vector<8x32xf32>
    %96 = vector.broadcast %8 : vector<1x32xf32> to vector<8x32xf32>
    %97 = arith.mulf %95, %96 : vector<8x32xf32>
    %98 = vector.broadcast %9 : vector<1x32xf32> to vector<8x32xf32>
    %99 = arith.addf %97, %98 : vector<8x32xf32>
    %c0_25 = arith.constant 0 : index
    %c0_26 = arith.constant 0 : index
    %100 = vector.load %arg8[%c0_25, %c0_26] : memref<32x64xf32, #tpu.memory_space<vmem>>, vector<32x64xf32>
    %cst_27 = arith.constant dense<0.000000e+00> : vector<8x64xf32>
    %101 = tpu.matmul %99, %100, %cst_27 {dimension_numbers = #tpu.dot_dimension_numbers<[1], [0], [0], [1], [0, 0, 1, 1], [], []>} : vector<8x32xf32>, vector<32x64xf32>, vector<8x64xf32> -> vector<8x64xf32>
    %c0_28 = arith.constant 0 : index
    %c0_29 = arith.constant 0 : index
    %102 = vector.load %arg9[%c0_28, %c0_29] : memref<1x64xf32, #tpu.memory_space<vmem>>, vector<1x64xf32>
    %103 = vector.broadcast %102 : vector<1x64xf32> to vector<8x64xf32>
    %104 = arith.addf %101, %103 : vector<8x64xf32>
    %cst_30 = arith.constant 0.000000e+00 : f32
    %105 = vector.broadcast %cst_30 : f32 to vector<8x64xf32>
    %106 = arith.maximumf %104, %105 : vector<8x64xf32>
    %c0_31 = arith.constant 0 : index
    %c0_32 = arith.constant 0 : index
    %107 = vector.load %arg10[%c0_31, %c0_32] : memref<64x32xf32, #tpu.memory_space<vmem>>, vector<64x32xf32>
    %cst_33 = arith.constant dense<0.000000e+00> : vector<8x32xf32>
    %108 = tpu.matmul %106, %107, %cst_33 {dimension_numbers = #tpu.dot_dimension_numbers<[1], [0], [0], [1], [0, 0, 1, 1], [], []>} : vector<8x64xf32>, vector<64x32xf32>, vector<8x32xf32> -> vector<8x32xf32>
    %109 = vector.broadcast %10 : vector<1x32xf32> to vector<8x32xf32>
    %110 = arith.addf %108, %109 : vector<8x32xf32>
    %111 = arith.addf %99, %110 : vector<8x32xf32>
    %cst_34 = arith.constant dense<0.000000e+00> : vector<8xf32>
    %112 = vector.multi_reduction <add>, %111, %cst_34 [1] : vector<8x32xf32> to vector<8xf32>
    %113 = vector.shape_cast %112 : vector<8xf32> to vector<8x1xf32>
    %cst_35 = arith.constant 3.200000e+01 : f32
    %114 = vector.broadcast %cst_35 : f32 to vector<8x1xf32>
    %115 = arith.divf %113, %114 : vector<8x1xf32>
    %116 = vector.broadcast %115 : vector<8x1xf32> to vector<8x32xf32>
    %117 = arith.subf %111, %116 : vector<8x32xf32>
    %118 = arith.mulf %117, %117 : vector<8x32xf32>
    %cst_36 = arith.constant dense<0.000000e+00> : vector<8xf32>
    %119 = vector.multi_reduction <add>, %118, %cst_36 [1] : vector<8x32xf32> to vector<8xf32>
    %120 = vector.shape_cast %119 : vector<8xf32> to vector<8x1xf32>
    %cst_37 = arith.constant 3.200000e+01 : f32
    %121 = vector.broadcast %cst_37 : f32 to vector<8x1xf32>
    %122 = arith.divf %120, %121 : vector<8x1xf32>
    %123 = vector.broadcast %115 : vector<8x1xf32> to vector<8x32xf32>
    %124 = arith.subf %111, %123 : vector<8x32xf32>
    %cst_38 = arith.constant 9.99999974E-6 : f32
    %125 = vector.broadcast %cst_38 : f32 to vector<8x1xf32>
    %126 = arith.addf %122, %125 : vector<8x1xf32>
    %127 = math.rsqrt %126 : vector<8x1xf32>
    %128 = vector.broadcast %127 : vector<8x1xf32> to vector<8x32xf32>
    %129 = arith.mulf %124, %128 : vector<8x32xf32>
    %130 = vector.broadcast %11 : vector<1x32xf32> to vector<8x32xf32>
    %131 = arith.mulf %129, %130 : vector<8x32xf32>
    %132 = vector.broadcast %12 : vector<1x32xf32> to vector<8x32xf32>
    %133 = arith.addf %131, %132 : vector<8x32xf32>
    %c0_39 = arith.constant 0 : index
    %c0_40 = arith.constant 0 : index
    %134 = vector.load %arg11[%c0_39, %c0_40] : memref<8x32xf32, #tpu.memory_space<vmem>>, vector<8x32xf32>
    tpu.vector_store %arg11[%c0_39, %c0_40], %133 {strides = array<i32>} : memref<8x32xf32, #tpu.memory_space<vmem>>, vector<8x32xf32>,
    return
  }
  func.func @transform_0(%arg0: i32) -> (i32, i32) {
    %c0_i32 = arith.constant 0 : i32
    %c0_i32_0 = arith.constant 0 : i32
    return %arg0, %c0_i32 : i32, i32
  }
  func.func @transform_1(%arg0: i32) -> (i32, i32) {
    %c0_i32 = arith.constant 0 : i32
    %c0_i32_0 = arith.constant 0 : i32
    return %arg0, %c0_i32 : i32, i32
  }
  func.func @transform_2(%arg0: i32) -> (i32, i32) {
    %c0_i32 = arith.constant 0 : i32
    %c0_i32_0 = arith.constant 0 : i32
    %c0_i32_1 = arith.constant 0 : i32
    return %c0_i32, %c0_i32_0 : i32, i32
  }
  func.func @transform_3(%arg0: i32) -> (i32, i32) {
    %c0_i32 = arith.constant 0 : i32
    %c0_i32_0 = arith.constant 0 : i32
    %c0_i32_1 = arith.constant 0 : i32
    return %c0_i32, %c0_i32_0 : i32, i32
  }
  func.func @transform_4(%arg0: i32) -> (i32, i32) {
    %c0_i32 = arith.constant 0 : i32
    %c0_i32_0 = arith.constant 0 : i32
    %c0_i32_1 = arith.constant 0 : i32
    return %c0_i32, %c0_i32_0 : i32, i32
  }
  func.func @transform_5(%arg0: i32) -> (i32, i32) {
    %c0_i32 = arith.constant 0 : i32
    %c0_i32_0 = arith.constant 0 : i32
    %c0_i32_1 = arith.constant 0 : i32
    return %c0_i32, %c0_i32_0 : i32, i32
  }
  func.func @transform_6(%arg0: i32) -> (i32, i32) {
    %c0_i32 = arith.constant 0 : i32
    %c0_i32_0 = arith.constant 0 : i32
    %c0_i32_1 = arith.constant 0 : i32
    return %c0_i32, %c0_i32_0 : i32, i32
  }
  func.func @transform_7(%arg0: i32) -> (i32, i32) {
    %c0_i32 = arith.constant 0 : i32
    %c0_i32_0 = arith.constant 0 : i32
    %c0_i32_1 = arith.constant 0 : i32
    return %c0_i32, %c0_i32_0 : i32, i32
  }
  func.func @transform_8(%arg0: i32) -> (i32, i32) {
    %c0_i32 = arith.constant 0 : i32
    %c0_i32_0 = arith.constant 0 : i32
    %c0_i32_1 = arith.constant 0 : i32
    return %c0_i32, %c0_i32_0 : i32, i32
  }
  func.func @transform_9(%arg0: i32) -> (i32, i32) {
    %c0_i32 = arith.constant 0 : i32
    %c0_i32_0 = arith.constant 0 : i32
    %c0_i32_1 = arith.constant 0 : i32
    return %c0_i32, %c0_i32_0 : i32, i32
  }
  func.func @transform_10(%arg0: i32) -> (i32, i32) {
    %c0_i32 = arith.constant 0 : i32
    %c0_i32_0 = arith.constant 0 : i32
    return %arg0, %c0_i32 : i32, i32
  }
}

</mosaic_0001>

<bundles_post_ra>
// kernel: tpu_custom_call.1
= control target key start
LH: loop header
LB: loop body
LE: loop exit
PB: predicated region body
PF: predicated region fallthrough
CT: control target
= control target key end

     0   :  { %s1951_s0 = inlined_call_operand.hbm [shape: f32[16,32], index: 0, kind: input, shape index: {}]   ;;  %s1952_s1 = inlined_call_operand.hbm [shape: f32[16,32], index: 1, kind: input, shape index: {}]   ;;  %s1953_s2 = inlined_call_operand.vmem [shape: f32[32,32], index: 2, kind: input, shape index: {}]   ;;  %s1954_s3 = inlined_call_operand.vmem [shape: f32[32,32], index: 3, kind: input, shape index: {}]   ;;  %s1955_s4 = inlined_call_operand.vmem [shape: f32[32,32], index: 4, kind: input, shape index: {}]   ;;  %s1956_s5 = inlined_call_operand.hbm [shape: f32[32,32], index: 5, kind: input, shape index: {}]   ;;  %s1957_s6 = inlined_call_operand.hbm [shape: f32[9,32], index: 6, kind: input, shape index: {}]   ;;  %s1958_s7 = inlined_call_operand.hbm [shape: f32[32,64], index: 7, kind: input, shape index: {}]   ;;  %s1959_s8 = inlined_call_operand.vmem [shape: f32[1,64], index: 8, kind: input, shape index: {}]   ;;  %s1960_s9 = inlined_call_operand.vmem [shape: f32[64,32], index: 9, kind: input, shape index: {}]   ;;  %s1961_s10 = inlined_call_operand.hbm [shape: f32[16,32], index: 10, kind: output, shape index: {}]  }
   0x1   :  { %1968 = sst [smem:[#allocation23_spill]] %s1956_s5 }
   0x2   :  { %1969 = sst [smem:[#allocation24_spill]] %s1957_s6 }
   0x3   :  { %1970 = sst [smem:[#allocation25_spill]] %s1958_s7 }
   0x4   :  { %15 = vsyncpa [#allocation3], 0 }
   0x5   :  { %17 = vsyncpa [#allocation3 + $0x1], 0 }
   0x6   :  { %18 = vsyncpa [#allocation6], 0 }
   0x7   :  { %20 = vsyncpa [#allocation6 + $0x1], 0 }
   0x8   :  { %21 = vsyncpa [#allocation9], 0 }
   0x9   :  { %22 = vsyncpa [#allocation4], 0 }
   0xa   :  { %24 = vsyncpa [#allocation4 + $0x1], 0  ;;  %s1621_s13 = smov 0   ;;  %s1623_s14 = smov 0  }
   0xb   :  { %s1625_s15 = smov 0   ;;  %s1627_s16 = smov 0  }
   0xc LB: > { %1971 = sst [smem:[#allocation17_spill]] %s1540_s13  ;;  %s1645_s20 = sadd.s32 4294967295, %s1552_s16   ;;  %s1552_s16 = sphi %s1627_s16, %s1991_s16   ;;  %s1548_s15 = sphi %s1625_s15, %s1993_s15   ;;  %s1544_s14 = sphi %s1623_s14, %s1995_s14   ;;  %s1540_s13 = sphi %s1621_s13, %s1994_s13  }
   0xd   : > { %1972 = sst [smem:[#allocation18_spill]] %s1548_s15  ;;  %p1171_p0 = scmp.ge.s32.totalorder %s1552_s16, 1 }
   0xe   : > { %1973 = sst [smem:[#allocation19_spill]] %s1552_s16  ;;  %p51_p1 = scmp.eq.s32.totalorder %s1645_s20, 0 }
   0xf   : > { %s1974_s5 = sld [smem:[#allocation23_spill]]  ;;  %p281_p2 = scmp.lt.s32.totalorder %s1552_s16, 3 }
  0x10   : > { %s1554_s22 = smov [#allocation7]   ;;  %s1976_s6 = sld [smem:[#allocation24_spill]] }
  0x11   : > { %p1650_p3 = pnand %p1171_p0, %p281_p2  ;;  %s303_s23 = sshll.u32 %s1554_s22, 4  ;;  %s304_s23 = int_to_ptr.vmem [resolvable:$true] %s303_s23 }
  0x12   : > { %s1978_s7 = sld [smem:[#allocation25_spill]]  ;;  %s1555_s11 = smov [#allocation8]  }
  0x13   : > { %p1227_p4 = pneg %p1650_p3  ;;  %s317_s12 = sshll.u32 %s1555_s11, 4  ;;  %s318_s12 = int_to_ptr.vmem [resolvable:$true] %s317_s12 }
  0x14   : > { %s1556_s17 = smov 128   ;;  %s1557_s18 = smov 8  }
  0x15   : > { %s301_s19 = sshll.u32 %s1974_s5, 4  ;;  %p1662_p6 = pnand %p1227_p4, %p51_p1  ;;  %s302_s19 = int_to_ptr.hbm [resolvable:$true] %s301_s19 }
  0x16   : > { %s315_s26 = sshll.u32 %s1976_s6, 4  ;;  %s1558_s22 = smov [#allocation10]   ;;  %s316_s26 = int_to_ptr.hbm [resolvable:$true] %s315_s26 }
  0x17   : > { %1230 = dma.hbm_to_vmem [thread:$0]  (!%p1662_p6), %s302_s19, 512, %s304_s23, [#allocation6], %s1556_s17, %s1556_s17, %s1557_s18  }
  0x18   : > { %s329_s30 = sshll.u32 %s1978_s7, 4  ;;  %s331_s24 = sshll.u32 %s1558_s22, 4  ;;  %s330_s30 = int_to_ptr.hbm [resolvable:$true] %s329_s30  ;;  %s332_s24 = int_to_ptr.vmem [resolvable:$true] %s331_s24 }
  0x19   : > { %1233 = dma.hbm_to_vmem [thread:$0]  (!%p1662_p6), %s316_s26, 256, %s318_s12, [#allocation9], %s1556_s17, %s1556_s17, %s1557_s18  }
  0x1a   : > { %1236 = dma.hbm_to_vmem [thread:$0]  (!%p1662_p6), %s330_s30, 512, %s332_s24, [#allocation9], %s1556_s17, %s1556_s17, %s1557_s18  }
  0x1b   : > { %s1170_s25 = sadd.s32 4294967294, %s1552_s16   ;;  %s1677_s28 = sadd.s32 1, %s1552_s16  }
  0x1c   : > { %1979 = sst [smem:[#allocation20_spill]] %s1677_s28  ;;  %s37_s29 = sadd.s32 1, %s1548_s15 }
  0x1d   : > { %s34_s19 = ssub.s32 %s1552_s16, %s1677_s28  ;;  %p44_p7 = scmp.ne.s32.totalorder %s1548_s15, %s1544_s14 }
  0x1e   : > { %p35_p8 = scmp.eq.s32.totalorder %s34_s19, 0  ;;  %p45_p9 = scmp.eq.s32.totalorder %s1552_s16, 0 }
  0x1f   : > { %p50_p10 = scmp.ne.s32.totalorder %s1544_s14, %s1540_s13  ;;  %p268_p11 = scmp.eq.s32.totalorder %s1645_s20, 1 }
  0x20   : > { %s1689_s23 = scalar_select %p35_p8, %s1548_s15, %s37_s29  }
  0x21   : > { %p1691_p12 = por %p45_p9, %p44_p7  ;;  %p1697_p13 = por %p51_p1, %p50_p10 }
  0x22   : > { %1980 = sst [smem:[#allocation21_spill]] %s1689_s23  ;;  %p1701_p0 = por %p268_p11, %p44_p7 }
  0x23   : > { %p274_p2 = scmp.eq.s32.totalorder %s1170_s25, 1  ;;  %p1251_p4 = scmp.lt.s32.totalorder %s1552_s16, 2 }
  0x24   : > { %s351_s11 = sand.u32 1, %s1548_s15   ;;  %s1177_s18 = sshll.u32 %s1552_s16, 3 }
  0x25   : > { %p1707_p6 = por %p274_p2, %p50_p10  ;;  %s1176_s17 = sshll.u32 %s351_s11, 3 }
  0x26   : > { %s359_s29 = scalar_lea.hbm %s1951_s0, %s1177_s18  ;;  %s355_s5 = scalar_lea.vmem [#allocation2], %s1176_s17 }
  0x27   : > { %s1984_s12 = scalar_select %p1707_p6, 1, 0 }
  0x28   : > { %s361_s19 = sshll.u32 %s359_s29, 4  ;;  %s363_s6 = sshll.u32 %s355_s5, 4  ;;  %s362_s19 = int_to_ptr.hbm [resolvable:$true] %s361_s19  ;;  %s364_s6 = int_to_ptr.vmem [resolvable:$true] %s363_s6 }
  0x29   : > { %1985 = sst [smem:[#allocation22_spill]] %s1984_s12  ;;  %p1717_p7 = pnand %p1251_p4, %p1691_p12 }
  0x2a   : > { %s378_s15 = scalar_lea.hbm %s1952_s1, %s1177_s18  ;;  %s370_s28 = sand.u32 1, %s1552_s16  }
  0x2b   : > { %s352_s12 = scalar_lea.sflag [#allocation3], %s351_s11  ;;  %s1414_s22 = sshra.s32 %s362_s19, 4  ;;  %s1415_s22 = int_to_ptr.hbm [resolvable:$true] %s1414_s22 }
  0x2c   : > { %s1416_s24 = scalar_lea.hbm %s1415_s22, 8  ;;  %p1418_p9 = pneg %p1717_p7 }
  0x2d   : > { %p1417_p8 = scmp.ne.s32.totalorder %s1415_s22, %s1416_s24  ;;  %s1421_s29 = scalar_lea.hbm %s1951_s0, 16 }
  0x2e   : > { %p1422_p12 = scmp.lt.s32.totalorder %s1415_s22, %s1951_s0  ;;  %p1423_p2 = scmp.lt.s32.totalorder %s1421_s29, %s1416_s24 }
  0x2f   : > { %p1419_p10 = pnand %p1418_p9, %p1417_p8 }
  0x30   : > { %p1424_p4 = por %p1423_p2, %p1422_p12 }
  0x31   : > { %p1420_p11 = pneg %p1419_p10 }
  0x33   : > { %p1425_p5 = pnand %p1424_p4, %p1420_p11 }
  0x35   : > { %1428 = shalt.err (!%p1425_p5)
}
  0x36   : > { %1240 = dma.hbm_to_vmem [thread:$0]  (!%p1717_p7), %s362_s19, 128, %s364_s6, %s352_s12  }
  0x37   : > { %s380_s11 = sshll.u32 %s378_s15, 4  ;;  %s374_s18 = scalar_lea.vmem [#allocation5], %s1176_s17  ;;  %s381_s11 = int_to_ptr.hbm [resolvable:$true] %s380_s11 }
  0x38   : > { %s382_s16 = sshll.u32 %s374_s18, 4  ;;  %s371_s13 = scalar_lea.sflag [#allocation6], %s370_s28  ;;  %s383_s16 = int_to_ptr.vmem [resolvable:$true] %s382_s16 }
  0x39   : > { %s1444_s5 = sshra.s32 %s381_s11, 4  ;;  %s1451_s29 = scalar_lea.hbm %s1952_s1, 16  ;;  %s1445_s5 = int_to_ptr.hbm [resolvable:$true] %s1444_s5 }
  0x3a   : > { %s1446_s26 = scalar_lea.hbm %s1445_s5, 8  ;;  %p1452_p5 = scmp.lt.s32.totalorder %s1445_s5, %s1952_s1 }
  0x3b   : > { %p1447_p8 = scmp.ne.s32.totalorder %s1445_s5, %s1446_s26  ;;  %p1453_p11 = scmp.lt.s32.totalorder %s1451_s29, %s1446_s26 }
  0x3d   : > { %p1449_p10 = pnand %p1447_p8, %p1418_p9  ;;  %p1454_p2 = por %p1453_p11, %p1452_p5 }
  0x3f   : > { %p1450_p12 = pneg %p1449_p10 }
  0x41   : > { %p1455_p4 = pnand %p1454_p2, %p1450_p12 }
  0x43   : > { %1458 = shalt.err (!%p1455_p4)
}
  0x44   : > { %1243 = dma.hbm_to_vmem [thread:$0]  (!%p1717_p7), %s381_s11, 128, %s383_s16, %s371_s13  }
  0x45   : > { %391 = sbr.rel (%p1650_p3) target bundleno = 1943 (0x797), region = 60  ;;  %s1752_s15 = sand.u32 (!%p1650_p3), 1, %s1544_s14  }
  0x46   : > { %s1755_s28 = sshll.u32 (!%p1650_p3), %s1752_s15, 3  ;;  %s394_s12 = scalar_lea.sflag (!%p1650_p3), [#allocation3], %s1752_s15 }
  0x47   : > { %s397_s17 = scalar_lea.vmem (!%p1650_p3), [#allocation2], %s1755_s28 }
  0x4a   : > { %1519 = dma.done.wait (%p1697_p13), %s394_s12, 128  }
  0x4b   : > { %1521 = vsyncadd (%p1697_p13), %s394_s12, 4294967168  ;;  %s403_s13 = sand.u32 1, %s1645_s20   ;;  %s407_s21 = scalar_lea.vmem [#allocation5], %s1755_s28 }
  0x4c   : > { %s404_s16 = scalar_lea.sflag [#allocation6], %s403_s13 }
  0x4d   : > { %1523 = dma.done.wait (%p1697_p13), %s404_s16, 128  }
  0x4e   : > { %1525 = vsyncadd (%p1697_p13), %s404_s16, 4294967168 }
  0x4f   : > { %1527 = dma.done.wait (%p51_p1), [#allocation6], 512  }
  0x50   : > { %1529 = vsyncadd (%p51_p1), [#allocation6], 4294966784 }
  0x51   : > { %1531 = dma.done.wait (%p51_p1), [#allocation9], 768  }
  0x52   : > { %1533 = vsyncadd (%p51_p1), [#allocation9], 4294966528  ;;  %v473_v0 = vld [vmem:[%s1953_s2 + $0x18] sm:$0xff]  ;;  %v472_v1 = vld [vmem:[%s1953_s2 + $0x10] sm:$0xff]  ;;  %vm475_vm0 = vcmask 261120   ;;  %s1559_s16 = smov 112  }
  0x53   : > { %491 = vmatpush.msra.mxu1 %v473_v0  ;;  %v1783_v2 = vld [vmem:[%s397_s17] sm:$0xff]  ;;  %v466_v3 = vld [vmem:[%s407_s21] sm:$0xff]  ;;  %vm576_vm1 = vcmask 64512   ;;  %s1560_s21 = smov 120   ;;  %s1561_s19 = smov 104  }
  0x54   : > { %v471_v4 = vld [vmem:[%s1953_s2 + $0x8] sm:$0xff]  ;;  %v470_v5 = vld [vmem:[%s1953_s2] sm:$0xff]  ;;  %v467_v6 = vadd.f32 %v466_v3, %v1783_v2  ;;  %v502_v7 = vld [vmem:[%s1954_s3 + $0x18] sm:$0xff]  ;;  %s1562_s24 = smov 16   ;;  %s1563_s29 = smov 8  }
  0x55   : > { %492 = vmatpush.msra.mxu1 %v472_v1  ;;  %v501_v8 = vld [vmem:[%s1954_s3 + $0x10] sm:$0xff]  ;;  %v500_v9 = vld [vmem:[%s1954_s3 + $0x8] sm:$0xff]  ;;  %v499_v10 = vld [vmem:[%s1954_s3] sm:$0xff]  ;;  %s1564_s7 = smov 24   ;;  %s1206_s6 = sshll.u32 %s1645_s20, 3 }
  0x56   : > { %v1806_v11 = vld [vmem:[#allocation8] sm:$0xff]  ;;  %v527_v24 = vld [vmem:[%s1955_s4 + $0x18] sm:$0xff]  ;;  %v526_v25 = vld [vmem:[%s1955_s4 + $0x10] sm:$0xff]  ;;  %s1044_s13 = scalar_lea.hbm %s1961_s10, %s1206_s6  ;;  %s1034_s20 = scalar_lea.sflag [#allocation4], %s1752_s15 }
  0x57   : > { %493 = vmatpush.msra.mxu1 %v471_v4  ;;  %v474_v12 = vperm.slane %v1806_v11, 0  ;;  %v503_v15 = vperm.slane %v1806_v11, 1  ;;  %544 = vmatpush.msra.mxu2 %v527_v24  ;;  %v525_v26 = vld [vmem:[%s1955_s4 + $0x8] sm:$0xff]  ;;  %v524_v27 = vld [vmem:[%s1955_s4] sm:$0xff]  ;;  %v528_v37 = vperm.slane %v1806_v11, 2 }
  0x59   : > { %494 = vmatpush.msra.mxu1 %v470_v5  ;;  %545 = vmatpush.msra.mxu2 %v526_v25 }
  0x5a   : > { %1187 = vmatmul.msk.f32.vlgmr.msra.gmra.mxu1 %vm475_vm0, %v467_v6 }
  0x5b   : > { %516 = vmatpush.msrb.mxu1 %v502_v7  ;;  %546 = vmatpush.msra.mxu2 %v525_v26 }
  0x5d   : > { %517 = vmatpush.msrb.mxu1 %v501_v8  ;;  %547 = vmatpush.msra.mxu2 %v524_v27 }
  0x5e   : > { %1189 = vmatmul.msk.f32.vlgmr.msra.gmra.mxu2 %vm475_vm0, %v1783_v2 }
  0x5f   : > { %518 = vmatpush.msrb.mxu1 %v500_v9 }
  0x61   : > { %519 = vmatpush.msrb.mxu1 %v499_v10 }
  0x62   : > { %1188 = vmatmul.msk.f32.vlgmr.msrb.gmra.mxu1 %vm475_vm0, %v467_v6 }
  0xd7   : > { %v496_v13 = vpop.f32.mrf.mxu1 }
  0xd8   : > { %v497_v14 = vadd.f32 %v496_v13, %v474_v12 }
  0xda   : > { %555 = vrot.lane.b32.xlu2 %v497_v14, %s1559_s16 }
  0xdf   : > { %v521_v16 = vpop.f32.mrf.mxu1 }
  0xe0   : > { %v522_v17 = vadd.f32 %v521_v16, %v503_v15 }
  0xe1   : > { %v549_v40 = vpop.f32.mrf.mxu2 }
  0xe2   : > { %562 = vrot.lane.b32.xlu1 %v522_v17, %s1559_s16  ;;  %560 = vrot.lane.b32.xlu0 %v522_v17, %s1560_s21  ;;  %v550_v41 = vadd.f32 %v549_v40, %v528_v37 }
  0xe3   : > { %1190 = vmatpush.xpose.msk.msra.mxu3 %vm576_vm1, %v522_v17  ;;  %557 = vrot.lane.b32.xlu2 %v497_v14, %s1561_s19 }
  0xe4   : > { %787 = vmatpush.msrb.mxu2 %v550_v41 }
  0xe6   : > { %1191 = vmatmul.msk.f32.vlgmr.msra.gmra.mxu3 %vm576_vm1, %v497_v14 }
  0xea   : > { %564 = vrot.lane.b32.xlu1 %v522_v17, %s1561_s19  ;;  %553 = vrot.lane.b32.xlu0 %v497_v14, %s1560_s21 }
 0x134   : > { %v556_v20 = vpop.permute.xlu2 %555 }
 0x13d   : > { %v558_v23 = vpop.permute.xlu2 %557 }
 0x154   : > { %v563_v18 = vpop.permute.xlu1 %562  ;;  %v561_v19 = vpop.permute.xlu0 %560 }
 0x155   : > { %1192 = vmatpush.xpose.msk.msrb.mxu3 %vm576_vm1, %v561_v19  ;;  %1194 = vmatpush.xpose.msk.msra.mxu0 %vm576_vm1, %v563_v18 }
 0x158   : > { %1195 = vmatmul.msk.f32.vlgmr.msra.gmra.mxu0 %vm576_vm1, %v556_v20 }
 0x15c   : > { %v565_v21 = vpop.permute.xlu1 %564  ;;  %v554_v22 = vpop.permute.xlu0 %553 }
 0x15d   : > { %1193 = vmatmul.msk.f32.vlgmr.msrb.gmra.mxu3 %vm576_vm1, %v554_v22  ;;  %1196 = vmatpush.xpose.msk.msra.mxu1 %vm576_vm1, %v565_v21 }
 0x160   : > { %1197 = vmatmul.msk.f32.vlgmr.msra.gmra.mxu1 %vm576_vm1, %v558_v23 }
 0x169   : > { %v598_v30 = vpop.f32.mrf.mxu3 }
 0x16a   : > { %v673_v35 = vsel %vm576_vm1, %v598_v30, -inf }
 0x1d5   : > { %v646_v28 = vpop.f32.mrf.mxu0 }
 0x1d6   : > { %v679_v29 = vsel %vm576_vm1, %v646_v28, -inf }
 0x1d7   : > { %680 = vmax.xlane.f32.xlu1 %v679_v29 }
 0x1dd   : > { %v670_v31 = vpop.f32.mrf.mxu1 }
 0x1de   : > { %v682_v32 = vsel %vm576_vm1, %v670_v31, -inf }
 0x1df   : > { %683 = vmax.xlane.f32.xlu2 %v682_v32 }
 0x1e0   : > { %v622_v33 = vpop.f32.mrf.mxu3 }
 0x1e1   : > { %v676_v34 = vsel %vm576_vm1, %v622_v33, -inf }
 0x1e2   : > { %677 = vmax.xlane.f32.xlu0 %v676_v34 }
 0x1e7   : > { %674 = vmax.xlane.f32.xlu2 %v673_v35 }
 0x24a   : > { %v681_v36 = vpop.xlane.xlu1 %680 }
 0x24b   : > { %v687_v38 = vsub.f32 %v646_v28, %v681_v36 }
 0x24d   : > { %v693_v39 = vmul.f32 1.442695, %v687_v38 }
 0x24f   : > { %1302 = vpow2.f32 %v693_v39 }
 0x252   : > { %v684_v42 = vpop.xlane.xlu2 %683 }
 0x253   : > { %v688_v43 = vsub.f32 %v670_v31, %v684_v42 }
 0x255   : > { %v1843_v44 = vpop.eup %1302  ;;  %v695_v45 = vmul.f32 1.442695, %v688_v43  ;;  %v678_v46 = vpop.xlane.xlu0 %677 }
 0x256   : > { %v686_v47 = vsub.f32 %v622_v33, %v678_v46  ;;  %v703_v48 = vsel %vm576_vm1, %v1843_v44, 0.0 }
 0x257   : > { %1304 = vpow2.f32 %v695_v45  ;;  %704 = vadd.xlane.f32.xlu1 %v703_v48 }
 0x258   : > { %v691_v49 = vmul.f32 1.442695, %v686_v47 }
 0x25a   : > { %1306 = vpow2.f32 %v691_v49  ;;  %v675_v54 = vpop.xlane.xlu2 %674 }
 0x25b   : > { %v685_v55 = vsub.f32 %v598_v30, %v675_v54  ;;  %v878_v54 = vld [vmem:[#allocation7] sm:$0xff] }
 0x25d   : > { %v1847_v50 = vpop.eup %1304  ;;  %v689_v56 = vmul.f32 1.442695, %v685_v55 }
 0x25e   : > { %v706_v51 = vsel %vm576_vm1, %v1847_v50, 0.0 }
 0x25f   : > { %707 = vadd.xlane.f32.xlu2 %v706_v51  ;;  %1308 = vpow2.f32 %v689_v56  ;;  %v881_v51 = vld [vmem:[#allocation7 + $0x18] sm:$0xff] }
 0x260   : > { %v1851_v52 = vpop.eup %1306  ;;  %898 = vmatpush.msra.mxu2 %v881_v51 }
 0x261   : > { %v700_v53 = vsel %vm576_vm1, %v1851_v52, 0.0 }
 0x262   : > { %701 = vadd.xlane.f32.xlu0 %v700_v53  ;;  %v879_v53 = vld [vmem:[#allocation7 + $0x8] sm:$0xff] }
 0x265   : > { %v1858_v57 = vpop.eup %1308 }
 0x266   : > { %v697_v58 = vsel %vm576_vm1, %v1858_v57, 0.0 }
 0x270   : > { %570 = vrot.lane.b32.xlu1 %v550_v41, %s1559_s16  ;;  %s464_s16 = scalar_lea.vmem [#allocation11], %s1755_s28  ;;  %s1494_s28 = scalar_lea.hbm %s1961_s10, 16 }
 0x276   : > { %567 = vrot.lane.b32.xlu0 %v550_v41, %s1560_s21  ;;  %s1046_s21 = sshll.u32 %s464_s16, 4  ;;  %s1047_s21 = int_to_ptr.vmem [resolvable:$true] %s1046_s21 }
 0x277   : > { %573 = vrot.lane.b32.xlu2 %v550_v41, %s1561_s19  ;;  %s1048_s19 = sshll.u32 %s1044_s13, 4  ;;  %s1049_s19 = int_to_ptr.hbm [resolvable:$true] %s1048_s19 }
 0x278   : > { %s1488_s25 = sshra.s32 %s1049_s19, 4  ;;  %s1489_s25 = int_to_ptr.hbm [resolvable:$true] %s1488_s25 }
 0x279   : > { %s1490_s23 = scalar_lea.hbm %s1489_s25, 8  ;;  %p1495_p7 = scmp.lt.s32.totalorder %s1489_s25, %s1961_s10 }
 0x27a   : > { %p1491_p1 = scmp.ne.s32.totalorder %s1489_s25, %s1490_s23  ;;  %p1496_p9 = scmp.lt.s32.totalorder %s1494_s28, %s1490_s23 }
 0x27c   : > { %p1492_p3 = pnand %p1491_p1, %p1701_p0  ;;  %p1497_p8 = por %p1496_p9, %p1495_p7 }
 0x27e   : > { %p1493_p13 = pneg %p1492_p3 }
 0x280   : > { %p1498_p10 = pnand %p1497_p8, %p1493_p13 }
 0x2a0   : > { %698 = vadd.xlane.f32.xlu0 %v697_v58 }
 0x2ca   : > { %v705_v59 = vpop.xlane.xlu1 %704 }
 0x2cb   : > { %1310 = vrcp.f32 %v705_v59  ;;  %v748_v5 = vand.u32 2147483648, %v705_v59  ;;  %vm742_vm3 = vweird.f32 %v705_v59  ;;  %v746_v6 = vand.u32 2147483647, %v705_v59 }
 0x2cd   : > { %v749_v13 = vor.u32 1.1754944e-38, %v748_v5  ;;  %vm747_vm5 = vcmp.eq.f32.partialorder %v746_v6, 8.507059e+37 }
 0x2d1   : > { %v1311_v60 = vpop.eup %1310 }
 0x2d2   : > { %v738_v61 = vmul.f32 %v1311_v60, %v705_v59  ;;  %v708_v62 = vpop.xlane.xlu2 %707  ;;  %vm743_vm2 = vweird.f32 %v1311_v60 }
 0x2d3   : > { %1312 = vrcp.f32 %v708_v62  ;;  %vm744_vm4 = vmor %vm742_vm3, %vm743_vm2  ;;  %v762_v14 = vand.u32 2147483648, %v708_v62  ;;  %v760_v17 = vand.u32 2147483647, %v708_v62  ;;  %vm756_vm7 = vweird.f32 %v708_v62 }
 0x2d4   : > { %v739_v63 = vsub.f32 1.0, %v738_v61 }
 0x2d5   : > { %v702_v0 = vpop.xlane.xlu0 %701  ;;  %v763_v22 = vor.u32 1.1754944e-38, %v762_v14  ;;  %vm761_vm10 = vcmp.eq.f32.partialorder %v760_v17, 8.507059e+37  ;;  %v942_v17 = vld [vmem:[#allocation10 + $0x10] sm:$0xff] }
 0x2d6   : > { %v740_v1 = vmul.f32 %v1311_v60, %v739_v63  ;;  %1314 = vrcp.f32 %v702_v0  ;;  %v734_v21 = vand.u32 2147483648, %v702_v0  ;;  %v732_v24 = vand.u32 2147483647, %v702_v0 }
 0x2d7   : > { %vm728_vm11 = vweird.f32 %v702_v0 }
 0x2d8   : > { %v741_v3 = vadd.f32 %v1311_v60, %v740_v1  ;;  %v735_v30 = vor.u32 1.1754944e-38, %v734_v21  ;;  %vm733_vm13 = vcmp.eq.f32.partialorder %v732_v24, 8.507059e+37  ;;  %v978_v21 = vld [vmem:[%s1960_s9 + $0x30] sm:$0xff] }
 0x2d9   : > { %v1313_v4 = vpop.eup %1312 }
 0x2da   : > { %v752_v7 = vmul.f32 %v1313_v4, %v708_v62  ;;  %v574_v8 = vpop.permute.xlu2 %573  ;;  %v745_v12 = vsel %vm744_vm4, %v1311_v60, %v741_v3  ;;  %vm757_vm6 = vweird.f32 %v1313_v4  ;;  %vm874_vm4 = vcmask 130048  }
 0x2db   : > { %856 = vmatpush.msrb.mxu1 %v574_v8  ;;  %v750_v19 = vsel %vm747_vm5, %v749_v13, %v745_v12  ;;  %vm758_vm8 = vmor %vm756_vm7, %vm757_vm6  ;;  %vm876_vm5 = vcmask 195584   ;;  %v882_v62 = vperm.slane %v1806_v11, 3 }
 0x2dc   : > { %v1315_v9 = vpop.eup %1314  ;;  %v753_v10 = vsub.f32 1.0, %v752_v7  ;;  %v767_v27 = vmul.f32 %v1843_v44, %v750_v19  ;;  %v940_v19 = vld [vmem:[#allocation10] sm:$0xff] }
 0x2dd   : > { %v724_v15 = vmul.f32 %v1315_v9, %v702_v0  ;;  %vm729_vm9 = vweird.f32 %v1315_v9 }
 0x2de   : > { %v754_v16 = vmul.f32 %v1313_v4, %v753_v10  ;;  %vm730_vm12 = vmor %vm728_vm11, %vm729_vm9  ;;  %vm981_vm9 = vcmask 523264  }
 0x2df   : > { %v725_v18 = vsub.f32 1.0, %v724_v15 }
 0x2e0   : > { %v755_v20 = vadd.f32 %v1313_v4, %v754_v16  ;;  %v943_v16 = vld [vmem:[#allocation10 + $0x18] sm:$0xff] }
 0x2e1   : > { %v726_v23 = vmul.f32 %v1315_v9, %v725_v18  ;;  %v941_v18 = vld [vmem:[#allocation10 + $0x8] sm:$0xff] }
 0x2e2   : > { %v759_v25 = vsel %vm758_vm8, %v1313_v4, %v755_v20  ;;  %v571_v26 = vpop.permute.xlu1 %570  ;;  %v1565_v4 = vmov 32.0   ;;  %v979_v20 = vld [vmem:[%s1960_s9 + $0x38] sm:$0xff] }
 0x2e3   : > { %v764_v28 = vsel %vm761_vm10, %v763_v22, %v759_v25  ;;  %v727_v29 = vadd.f32 %v1315_v9, %v726_v23  ;;  %833 = vmatpush.msrb.mxu0 %v571_v26  ;;  %v977_v22 = vld [vmem:[%s1960_s9 + $0x28] sm:$0xff]  ;;  %v976_v25 = vld [vmem:[%s1960_s9 + $0x20] sm:$0xff] }
 0x2e4   : > { %1200 = vmatmul.msk.f32.vlgmr.msrb.gmra.mxu0 %vm576_vm1, %v767_v27  ;;  %v768_v31 = vmul.f32 %v1847_v50, %v764_v28  ;;  %v975_v27 = vld [vmem:[%s1960_s9 + $0x18] sm:$0xff] }
 0x2e5   : > { %v731_v32 = vsel %vm730_vm12, %v1315_v9, %v727_v29  ;;  %993 = vmatpush.msra.mxu0 %v979_v20 }
 0x2e6   : > { %v736_v33 = vsel %vm733_vm13, %v735_v30, %v731_v32  ;;  %1201 = vmatmul.msk.f32.vlgmr.msrb.gmra.mxu1 %vm576_vm1, %v768_v31 }
 0x2e7   : > { %v766_v34 = vmul.f32 %v1851_v52, %v736_v33  ;;  %v880_v52 = vld [vmem:[#allocation7 + $0x10] sm:$0xff]  ;;  %994 = vmatpush.msra.mxu0 %v978_v21 }
 0x2e8   : > { %v568_v35 = vpop.permute.xlu0 %567  ;;  %899 = vmatpush.msra.mxu2 %v880_v52 }
 0x2e9   : > { %810 = vmatpush.msra.mxu3 %v568_v35  ;;  %995 = vmatpush.msra.mxu0 %v977_v22 }
 0x2ea   : > { %1199 = vmatmul.msk.f32.vlgmr.msra.gmra.mxu3 %vm576_vm1, %v766_v34  ;;  %900 = vmatpush.msra.mxu2 %v879_v53  ;;  %v936_v34 = vperm.slane %v1806_v11, 4 }
 0x2eb   : > { %963 = vmatpush.msrb.mxu3 %v943_v16  ;;  %996 = vmatpush.msra.mxu0 %v976_v25 }
 0x2ec   : > { %901 = vmatpush.msra.mxu2 %v878_v54 }
 0x2ed   : > { %964 = vmatpush.msrb.mxu3 %v942_v17  ;;  %997 = vmatpush.msra.mxu0 %v975_v27 }
 0x2ef   : > { %965 = vmatpush.msrb.mxu3 %v941_v18 }
 0x2f1   : > { %966 = vmatpush.msrb.mxu3 %v940_v19 }
 0x313   : > { %v699_v36 = vpop.xlane.xlu0 %698 }
 0x314   : > { %1316 = vrcp.f32 %v699_v36  ;;  %v720_v40 = vand.u32 2147483648, %v699_v36  ;;  %v718_v42 = vand.u32 2147483647, %v699_v36  ;;  %vm714_vm15 = vweird.f32 %v699_v36 }
 0x315   : > { %1318 = vrcp.f32 %v1565_v4 }
 0x316   : > { %v721_v44 = vor.u32 1.1754944e-38, %v720_v40  ;;  %vm719_vm3 = vcmp.eq.f32.partialorder %v718_v42, 8.507059e+37  ;;  %v974_v40 = vld [vmem:[%s1960_s9 + $0x10] sm:$0xff]  ;;  %v972_v42 = vld [vmem:[%s1960_s9] sm:$0xff] }
 0x317   : > { %998 = vmatpush.msra.mxu0 %v974_v40 }
 0x31a   : > { %v1317_v37 = vpop.eup %1316 }
 0x31b   : > { %v710_v38 = vmul.f32 %v1317_v37, %v699_v36  ;;  %vm715_vm14 = vweird.f32 %v1317_v37  ;;  %v1319_v5 = vpop.eup %1318 }
 0x31c   : > { %vm716_vm2 = vmor %vm714_vm15, %vm715_vm14  ;;  %v911_v6 = vmul.f32 32.0, %v1319_v5 }
 0x31d   : > { %v711_v39 = vsub.f32 1.0, %v710_v38 }
 0x31e   : > { %v912_v7 = vsub.f32 1.0, %v911_v6  ;;  %v1301_v6 = vld [vmem:[#allocation8 + $0x8] ss:$0 sm:$0xff] }
 0x31f   : > { %v712_v41 = vmul.f32 %v1317_v37, %v711_v39 }
 0x320   : > { %v913_v8 = vmul.f32 %v1319_v5, %v912_v7 }
 0x321   : > { %v713_v43 = vadd.f32 %v1317_v37, %v712_v41  ;;  %v973_v41 = vld [vmem:[%s1960_s9 + $0x8] sm:$0xff] }
 0x322   : > { %v914_v9 = vadd.f32 %v1319_v5, %v913_v8  ;;  %999 = vmatpush.msra.mxu0 %v973_v41 }
 0x323   : > { %v717_v45 = vsel %vm716_vm2, %v1317_v37, %v713_v43  ;;  %v938_v37 = vperm.slane %v1806_v11, 5  ;;  %v1300_v43 = vld [vmem:[%s1959_s8] ss:$0 sm:$0xff] }
 0x324   : > { %v722_v46 = vsel %vm719_vm3, %v721_v44, %v717_v45  ;;  %1000 = vmatpush.msra.mxu0 %v972_v42 }
 0x325   : > { %v765_v47 = vmul.f32 %v1858_v57, %v722_v46 }
 0x327   : > { %1198 = vmatmul.msk.f32.vlgmr.msrb.gmra.mxu2 %vm576_vm1, %v765_v47  ;;  %v980_v47 = vperm.slane %v1806_v11, 6 }
 0x361   : > { %v835_v48 = vpop.f32.mrf.mxu0 }
 0x362   : > { %866 = vrot.lane.b32.xlu2 %v835_v48, %s1562_s24 }
 0x363   : > { %v858_v50 = vpop.f32.mrf.mxu1 }
 0x36d   : > { %v812_v49 = vpop.f32.mrf.mxu3 }
 0x36e   : > { %862 = vrot.lane.b32.xlu1 %v812_v49, %s1563_s29 }
 0x376   : > { %870 = vrot.lane.b32.xlu1 %v858_v50, %s1564_s7 }
 0x3aa   : > { %v789_v56 = vpop.f32.mrf.mxu2 }
 0x3bc   : > { %v867_v58 = vpop.permute.xlu2 %866 }
 0x3e0   : > { %v863_v55 = vpop.permute.xlu1 %862 }
 0x3e1   : > { %v873_v57 = vsel %vm576_vm1, %v789_v56, %v863_v55  ;;  %vm915_vm1 = vweird.f32 %v1319_v5 }
 0x3e2   : > { %v875_v60 = vsel %vm874_vm4, %v873_v57, %v867_v58  ;;  %v1875_v10 = vsel %vm915_vm1, %v1319_v5, %v914_v9 }
 0x3e8   : > { %v871_v59 = vpop.permute.xlu1 %870 }
 0x3e9   : > { %v877_v61 = vsel %vm876_vm5, %v875_v60, %v871_v59 }
 0x3ea   : > { %1202 = vmatmul.msk.f32.vlgmr.msra.gmra.mxu2 %vm475_vm0, %v877_v61 }
 0x46d   : > { %v903_v63 = vpop.f32.mrf.mxu2 }
 0x46e   : > { %v904_v0 = vadd.f32 %v903_v63, %v882_v62 }
 0x470   : > { %v906_v1 = vadd.f32 %v904_v0, %v1783_v2 }
 0x472   : > { %v907_v3 = vsel %vm475_vm0, %v906_v1, 0.0 }
 0x473   : > { %908 = vadd.xlane.f32.xlu2 %v907_v3  ;;  %v1028_v3 = vperm.slane %v1806_v11, 7 }
 0x4e6   : > { %v909_v12 = vpop.xlane.xlu2 %908 }
 0x4e7   : > { %v917_v13 = vmul.f32 %v1875_v10, %v909_v12 }
 0x4e9   : > { %v918_v14 = vsub.f32 %v906_v1, %v917_v13 }
 0x4eb   : > { %v919_v15 = vmul.f32 %v918_v14, %v918_v14 }
 0x4ed   : > { %v920_v2 = vsel %vm475_vm0, %v919_v15, 0.0 }
 0x4ee   : > { %921 = vadd.xlane.f32.xlu1 %v920_v2 }
 0x561   : > { %v922_v23 = vpop.xlane.xlu1 %921 }
 0x562   : > { %v923_v24 = vmul.f32 %v922_v23, %v1875_v10 }
 0x564   : > { %v924_v26 = vadd.f32 1e-05, %v923_v24 }
 0x566   : > { %1320 = vrsqrt.f32 %v924_v26  ;;  %vm931_vm7 = vweird.f32 %v924_v26 }
 0x56c   : > { %v1321_v28 = vpop.eup %1320 }
 0x56d   : > { %v926_v29 = vmul.f32 %v1321_v28, %v924_v26  ;;  %vm932_vm6 = vweird.f32 %v1321_v28 }
 0x56e   : > { %vm933_vm8 = vmor %vm931_vm7, %vm932_vm6 }
 0x56f   : > { %v927_v30 = vmul.f32 %v1321_v28, %v926_v29 }
 0x571   : > { %v928_v31 = vmul.f32 0.5, %v927_v30 }
 0x573   : > { %v929_v32 = vsub.f32 1.5, %v928_v31 }
 0x575   : > { %v930_v33 = vmul.f32 %v1321_v28, %v929_v32 }
 0x577   : > { %v934_v35 = vsel %vm933_vm8, %v1321_v28, %v930_v33 }
 0x578   : > { %v935_v36 = vmul.f32 %v934_v35, %v918_v14 }
 0x57a   : > { %v937_v38 = vmul.f32 %v936_v34, %v935_v36 }
 0x57c   : > { %v939_v39 = vadd.f32 %v938_v37, %v937_v38 }
 0x57e   : > { %1203 = vmatmul.msk.f32.vlgmr.msrb.gmra.mxu3 %vm475_vm0, %v939_v39 }
 0x601   : > { %v968_v44 = vpop.f32.mrf.mxu3 }
 0x602   : > { %v969_v45 = vadd.f32 %v1300_v43, %v968_v44 }
 0x604   : > { %v971_v46 = vmax.f32 %v969_v45, 0.0 }
 0x606   : > { %1204 = vmatmul.msk.f32.vlgmr.msra.gmra.mxu0 %vm981_vm9, %v971_v46 }
 0x683   : > { %v1002_v48 = vpop.f32.mrf.mxu0 }
 0x684   : > { %v1003_v49 = vadd.f32 %v1002_v48, %v980_v47 }
 0x686   : > { %v1005_v50 = vadd.f32 %v1003_v49, %v939_v39 }
 0x688   : > { %v1006_v51 = vsel %vm475_vm0, %v1005_v50, 0.0 }
 0x689   : > { %1007 = vadd.xlane.f32.xlu0 %v1006_v51 }
 0x6fc   : > { %v1008_v52 = vpop.xlane.xlu0 %1007 }
 0x6fd   : > { %v1009_v53 = vmul.f32 %v1008_v52, %v1875_v10 }
 0x6ff   : > { %v1010_v54 = vsub.f32 %v1005_v50, %v1009_v53 }
 0x701   : > { %v1011_v55 = vmul.f32 %v1010_v54, %v1010_v54 }
 0x703   : > { %v1012_v56 = vsel %vm475_vm0, %v1011_v55, 0.0 }
 0x704   : > { %1013 = vadd.xlane.f32.xlu0 %v1012_v56 }
 0x777   : > { %v1014_v57 = vpop.xlane.xlu0 %1013 }
 0x778   : > { %v1015_v58 = vmul.f32 %v1014_v57, %v1875_v10 }
 0x77a   : > { %v1016_v59 = vadd.f32 1e-05, %v1015_v58 }
 0x77c   : > { %1322 = vrsqrt.f32 %v1016_v59  ;;  %vm1023_vm11 = vweird.f32 %v1016_v59 }
 0x782   : > { %v1323_v60 = vpop.eup %1322 }
 0x783   : > { %v1018_v61 = vmul.f32 %v1323_v60, %v1016_v59  ;;  %vm1024_vm10 = vweird.f32 %v1323_v60 }
 0x784   : > { %vm1025_vm12 = vmor %vm1023_vm11, %vm1024_vm10 }
 0x785   : > { %v1019_v62 = vmul.f32 %v1323_v60, %v1018_v61 }
 0x787   : > { %v1020_v63 = vmul.f32 0.5, %v1019_v62 }
 0x789   : > { %v1021_v0 = vsub.f32 1.5, %v1020_v63 }
 0x78b   : > { %v1022_v1 = vmul.f32 %v1323_v60, %v1021_v0 }
 0x78d   : > { %v1026_v4 = vsel %vm1025_vm12, %v1323_v60, %v1022_v1 }
 0x78e   : > { %v1027_v5 = vmul.f32 %v1026_v4, %v1010_v54 }
 0x790   : > { %v1029_v7 = vmul.f32 %v1028_v3, %v1027_v5 }
 0x792   : > { %v1031_v8 = vadd.f32 %v1301_v6, %v1029_v7 }
 0x794   : > { %1032 = vst.msk [vmem:[%s464_s16] sm:$0xff] %vm475_vm0, %v1031_v8 }
 0x795   : > { %1501 = shalt.err (!%p1498_p10)
}
 0x796   : > { %1225 = dma.vmem_to_hbm [thread:$0]  (%p1701_p0), %s1047_s21, 128, %s1049_s19, %s1034_s20  }
 0x797 PF: > { %s1987_s15 = sld [smem:[#allocation17_spill]] }
 0x798   : > { %s1989_s22 = sld [smem:[#allocation19_spill]] }
 0x79d   : > { %s1060_s24 = sand.u32 1, %s1987_s15  }
 0x79e   : > { %p1990_p12 = scmp.ge.s32.totalorder %s1989_s22, 2  ;;  %s1061_s29 = scalar_lea.sflag [#allocation4], %s1060_s24 }
 0x7a0   : > { %p1245_p5 = pnand %p1990_p12, %p1707_p6 }
 0x7a2   : > { %p1246_p11 = pneg %p1245_p5 }
 0x7a4   : > { %1535 = dma.done.wait (%p1246_p11), %s1061_s29, 128  }
 0x7a5   : > { %1537 = vsyncadd (%p1246_p11), %s1061_s29, 4294967168  ;;  %s1991_s16 = sld [smem:[#allocation20_spill]]  ;;  %s1994_s13 = smov %s1544_s14 }
 0x7a6   : > { %s1992_s7 = sld [smem:[#allocation18_spill]] }
 0x7a7   : > { %s1993_s15 = sld [smem:[#allocation21_spill]] }
 0x7ab   : > { %p27_p2 = scmp.ge.s32.totalorder %s1991_s16, 4  }
 0x7ac   : > { %s1995_s14 = smov %s1992_s7 }
 0x7ad   :  { %29 = sbr.rel (!%p27_p2) target bundleno = 12 (0xc), region = 130 }
 0x7b2   :  { %1067 = vsyncpa [#allocation3], 1 }
 0x7b3   :  { %1069 = vsyncpa [#allocation3 + $0x1], 1 }
 0x7b4   :  { %1070 = vsyncpa [#allocation6], 1 }
 0x7b5   :  { %1072 = vsyncpa [#allocation6 + $0x1], 1 }
 0x7b6   :  { %1073 = vsyncpa [#allocation9], 1 }
 0x7b7   :  { %1074 = vsyncpa [#allocation4], 1 }
 0x7b8   :  { %1076 = vsyncpa [#allocation4 + $0x1], 1 }

</bundles_post_ra>
